<compile_context>
chip_gen: v7x
topology: tpu7x:2x2x1
jax: 0.10.0
libtpu: 0.0.40
codegen_flags: <defaults>
</compile_context>

<pallas_src>
import functools

import jax
import jax.numpy as jnp
from jax import lax
from jax.experimental import pallas as pl
from jax.experimental.pallas import tpu as pltpu

LANE = 128     # TPU lane width
TM_CAP = 2048  # max sublane rows per grid step (~1 MiB/tile/input in f32)


def _binary_loss_kernel(x_ref, t_ref, w_ref, out_ref, acc_ref, *,
                        n_elems, tiles_per_core, tm, need_mask):
    i = pl.program_id(1)

    @pl.when(i == 0)
    def _():
        acc_ref[...] = jnp.zeros_like(acc_ref)

    x = x_ref[...].astype(jnp.float32)
    t = t_ref[...].astype(jnp.float32)
    w = w_ref[...].astype(jnp.float32)

    # per-element loss: -w * (t*log(1+x) + (1-t)*log(2-x)); log1p == log(1+x)
    val = -w * (t * jnp.log1p(x) + (1.0 - t) * jnp.log(2.0 - x))

    if need_mask:
        # mask out padded / out-of-range elements (jnp.where is a select, so any
        # NaN/garbage computed from Pallas-padded rows is discarded, not propagated)
        c = pl.program_id(0)
        block_idx = c * tiles_per_core + i
        row = lax.broadcasted_iota(jnp.int32, (tm, LANE), 0)
        lane = lax.broadcasted_iota(jnp.int32, (tm, LANE), 1)
        flat = block_idx * (tm * LANE) + row * LANE + lane
        val = jnp.where(flat < n_elems, val, 0.0)

    # fold the (tm, 128) tile down to one (8, 128) vreg and accumulate in VMEM:
    # pure VPU adds per step; no per-step XLU reduction, no SMEM scalar RMW.
    acc_ref[...] += val.reshape(tm // 8, 8, LANE).sum(axis=0)

    @pl.when(i == pl.num_programs(1) - 1)
    def _():
        # single cross-lane/sublane reduction + normalization, done once per core
        out_ref[0, 0] = jnp.sum(acc_ref[...]) / jnp.float32(n_elems)


def _round_up(x, m):
    return (x + m - 1) // m * m


def binary_loss(inputs, targets, weights, smooth=1):
    """Pallas equivalent of binary_Loss.forward.

    NOTE: `smooth` is accepted but unused, exactly as in the PyTorch source.
    """
    n = inputs.size
    rows = pl.cdiv(n, LANE)
    lane_pad = rows * LANE - n  # < 128 elements; zero for the test shape

    def prep(a):
        a = a.reshape(-1)
        if lane_pad:
            a = jnp.pad(a, (0, lane_pad))
        return a.reshape(rows, LANE)

    xp, tp, wp = prep(inputs), prep(targets), prep(weights)

    tm = min(_round_up(rows, 8), TM_CAP)
    num_tiles = pl.cdiv(rows, tm)
    # use both TensorCores (v7x) only when the tile count splits evenly;
    # otherwise a single "core row" of the grid covers everything.
    ncores = 2 if (num_tiles >= 2 and num_tiles % 2 == 0) else 1
    tiles_per_core = num_tiles // ncores
    need_mask = (ncores * tiles_per_core * tm * LANE) != n

    kernel = functools.partial(
        _binary_loss_kernel,
        n_elems=n,
        tiles_per_core=tiles_per_core,
        tm=tm,
        need_mask=need_mask,
    )

    in_map = lambda c, i: (c * tiles_per_core + i, 0)

    out = pl.pallas_call(
        kernel,
        out_shape=jax.ShapeDtypeStruct((ncores, 1), jnp.float32),
        grid_spec=pltpu.PrefetchScalarGridSpec(
            num_scalar_prefetch=0,
            grid=(ncores, tiles_per_core),
            in_specs=[
                pl.BlockSpec((tm, LANE), in_map),
                pl.BlockSpec((tm, LANE), in_map),
                pl.BlockSpec((tm, LANE), in_map),
            ],
            out_specs=pl.BlockSpec((1, 1), lambda c, i: (c, 0),
                                   memory_space=pltpu.SMEM),
            scratch_shapes=[pltpu.VMEM((8, LANE), jnp.float32)],
        ),
        compiler_params=pltpu.CompilerParams(
            dimension_semantics=("parallel", "arbitrary"),
        ),
    )(xp, tp, wp)
    # sum per-core partials (each already divided by n, so the sum is the mean)
    return jnp.sum(out)


if __name__ == "__main__":
    key = jax.random.PRNGKey(0)
    k1, k2, k3 = jax.random.split(key, 3)
    shape = (2, 4, 16, 16)

    # inputs in (0, 1) so that log(1+x) and log(2-x) are well defined (as in the
    # typical sigmoid-output usage of this loss).
    inputs = jax.random.uniform(k1, shape, dtype=jnp.float32, minval=0.01, maxval=0.99)
    targets = jax.random.bernoulli(k2, 0.5, shape).astype(jnp.float32)
    weights = jax.random.uniform(k3, shape, dtype=jnp.float32, minval=0.5, maxval=1.5)

    loss = jax.block_until_ready(binary_loss(inputs, targets, weights))

    # pure-JAX reference
    ref = jnp.mean(
        -weights * (targets * jnp.log(1.0 + inputs) + (1.0 - targets) * jnp.log(2.0 - inputs))
    )
    assert jnp.allclose(loss, ref, rtol=1e-5, atol=1e-6), (loss, ref)
    print("KERNEL_OK")
</pallas_src>

<mosaic_0001>
module attributes {stable_mosaic.version = 11 : i64} {
  func.func @_binary_loss_kernel(%arg0: i32, %arg1: i32, %arg2: memref<16x128xf32, #tpu.memory_space<vmem>>, %arg3: memref<16x128xf32, #tpu.memory_space<vmem>>, %arg4: memref<16x128xf32, #tpu.memory_space<vmem>>, %arg5: memref<1x1xf32, #tpu.memory_space<smem>>, %arg6: memref<8x128xf32, #tpu.memory_space<vmem>>) attributes {dimension_semantics = [#tpu.dimension_semantics<parallel>, #tpu.dimension_semantics<arbitrary>], iteration_bounds = array<i64: 1, 1>, scalar_prefetch = 0 : i64, scratch_operands = 1 : i64, tpu.core_type = #tpu.core_type<tc>, window_params = [{transform_indices = @transform_0, window_bounds = array<i64: 16, 128>}, {transform_indices = @transform_1, window_bounds = array<i64: 16, 128>}, {transform_indices = @transform_2, window_bounds = array<i64: 16, 128>}, {transform_indices = @transform_3, window_bounds = array<i64: 1, 1>}]} {
    %c0_i32 = arith.constant 0 : i32
    %0 = arith.cmpi eq, %arg1, %c0_i32 : i32
    %1 = arith.extui %0 : i1 to i32
    %c0_i32_0 = arith.constant 0 : i32
    %2 = arith.cmpi ne, %1, %c0_i32_0 : i32
    scf.if %2 {
      %cst_15 = arith.constant 0.000000e+00 : f32
      %26 = vector.broadcast %cst_15 : f32 to vector<8x128xf32>
      %c0_16 = arith.constant 0 : index
      %c0_17 = arith.constant 0 : index
      %27 = vector.load %arg6[%c0_16, %c0_17] : memref<8x128xf32, #tpu.memory_space<vmem>>, vector<8x128xf32>
      tpu.vector_store %arg6[%c0_16, %c0_17], %26 {strides = array<i32>} : memref<8x128xf32, #tpu.memory_space<vmem>>, vector<8x128xf32>,
    } else {
    }
    %c0 = arith.constant 0 : index
    %c0_1 = arith.constant 0 : index
    %3 = vector.load %arg2[%c0, %c0_1] : memref<16x128xf32, #tpu.memory_space<vmem>>, vector<16x128xf32>
    %c0_2 = arith.constant 0 : index
    %c0_3 = arith.constant 0 : index
    %4 = vector.load %arg3[%c0_2, %c0_3] : memref<16x128xf32, #tpu.memory_space<vmem>>, vector<16x128xf32>
    %c0_4 = arith.constant 0 : index
    %c0_5 = arith.constant 0 : index
    %5 = vector.load %arg4[%c0_4, %c0_5] : memref<16x128xf32, #tpu.memory_space<vmem>>, vector<16x128xf32>
    %cst = arith.constant 0.000000e+00 : f32
    %6 = vector.broadcast %cst : f32 to vector<16x128xf32>
    %7 = arith.subf %6, %5 : vector<16x128xf32>
    %8 = math.log1p %3 : vector<16x128xf32>
    %9 = arith.mulf %4, %8 : vector<16x128xf32>
    %cst_6 = arith.constant 1.000000e+00 : f32
    %10 = vector.broadcast %cst_6 : f32 to vector<16x128xf32>
    %11 = arith.subf %10, %4 : vector<16x128xf32>
    %cst_7 = arith.constant 2.000000e+00 : f32
    %12 = vector.broadcast %cst_7 : f32 to vector<16x128xf32>
    %13 = arith.subf %12, %3 : vector<16x128xf32>
    %14 = math.log %13 : vector<16x128xf32>
    %15 = arith.mulf %11, %14 : vector<16x128xf32>
    %16 = arith.addf %9, %15 : vector<16x128xf32>
    %17 = arith.mulf %7, %16 : vector<16x128xf32>
    %c0_8 = arith.constant 0 : index
    %c0_9 = arith.constant 0 : index
    %18 = vector.load %arg6[%c0_8, %c0_9] : memref<8x128xf32, #tpu.memory_space<vmem>>, vector<8x128xf32>
    %19 = vector.shape_cast %17 : vector<16x128xf32> to vector<2x8x128xf32>
    %cst_10 = arith.constant dense<0.000000e+00> : vector<8x128xf32>
    %20 = vector.multi_reduction <add>, %19, %cst_10 [0] : vector<2x8x128xf32> to vector<8x128xf32>
    %21 = arith.addf %18, %20 : vector<8x128xf32>
    %c0_11 = arith.constant 0 : index
    %c0_12 = arith.constant 0 : index
    %22 = vector.load %arg6[%c0_11, %c0_12] : memref<8x128xf32, #tpu.memory_space<vmem>>, vector<8x128xf32>
    tpu.vector_store %arg6[%c0_11, %c0_12], %21 {strides = array<i32>} : memref<8x128xf32, #tpu.memory_space<vmem>>, vector<8x128xf32>,
    %c0_i32_13 = arith.constant 0 : i32
    %23 = arith.cmpi eq, %arg1, %c0_i32_13 : i32
    %24 = arith.extui %23 : i1 to i32
    %c0_i32_14 = arith.constant 0 : i32
    %25 = arith.cmpi ne, %24, %c0_i32_14 : i32
    scf.if %25 {
      %c0_15 = arith.constant 0 : index
      %c0_16 = arith.constant 0 : index
      %26 = vector.load %arg6[%c0_15, %c0_16] : memref<8x128xf32, #tpu.memory_space<vmem>>, vector<8x128xf32>
      %27 = vector.shape_cast %26 : vector<8x128xf32> to vector<1x8x128xf32>
      %cst_17 = arith.constant dense<0.000000e+00> : vector<1xf32>
      %28 = vector.multi_reduction <add>, %27, %cst_17 [1, 2] : vector<1x8x128xf32> to vector<1xf32>
      %29 = vector.shape_cast %28 : vector<1xf32> to vector<1x1x1xf32>
      %30 = vector.extract %29[0, 0, 0] : f32 from vector<1x1x1xf32>
      %cst_18 = arith.constant 2.048000e+03 : f32
      %31 = arith.divf %30, %cst_18 : f32
      %c0_19 = arith.constant 0 : index
      %c0_20 = arith.constant 0 : index
      %32 = memref.load %arg5[%c0_19, %c0_20] : memref<1x1xf32, #tpu.memory_space<smem>>
      memref.store %31, %arg5[%c0_19, %c0_20] : memref<1x1xf32, #tpu.memory_space<smem>>
    } else {
    }
    return
  }
  func.func @transform_0(%arg0: i32, %arg1: i32) -> (i32, i32) {
    %c1_i32 = arith.constant 1 : i32
    %0 = arith.muli %arg0, %c1_i32 : i32
    %1 = arith.addi %0, %arg1 : i32
    %c0_i32 = arith.constant 0 : i32
    %c0_i32_0 = arith.constant 0 : i32
    return %1, %c0_i32 : i32, i32
  }
  func.func @transform_1(%arg0: i32, %arg1: i32) -> (i32, i32) {
    %c1_i32 = arith.constant 1 : i32
    %0 = arith.muli %arg0, %c1_i32 : i32
    %1 = arith.addi %0, %arg1 : i32
    %c0_i32 = arith.constant 0 : i32
    %c0_i32_0 = arith.constant 0 : i32
    return %1, %c0_i32 : i32, i32
  }
  func.func @transform_2(%arg0: i32, %arg1: i32) -> (i32, i32) {
    %c1_i32 = arith.constant 1 : i32
    %0 = arith.muli %arg0, %c1_i32 : i32
    %1 = arith.addi %0, %arg1 : i32
    %c0_i32 = arith.constant 0 : i32
    %c0_i32_0 = arith.constant 0 : i32
    return %1, %c0_i32 : i32, i32
  }
  func.func @transform_3(%arg0: i32, %arg1: i32) -> (i32, i32) {
    %c0_i32 = arith.constant 0 : i32
    %c0_i32_0 = arith.constant 0 : i32
    return %arg0, %c0_i32 : i32, i32
  }
}

</mosaic_0001>

<bundles_post_ra>
// kernel: tpu_custom_call.1
= control target key start
LH: loop header
LB: loop body
LE: loop exit
PB: predicated region body
PF: predicated region fallthrough
CT: control target
= control target key end

     0   :  { %8 = vsyncpa [#allocation4], 0  ;;  %s346_s0 = inlined_call_operand.hbm [shape: f32[16,128], index: 0, kind: input, shape index: {}]   ;;  %s347_s1 = inlined_call_operand.hbm [shape: f32[16,128], index: 1, kind: input, shape index: {}]   ;;  %s348_s2 = inlined_call_operand.hbm [shape: f32[16,128], index: 2, kind: input, shape index: {}]   ;;  %s349_s3 = inlined_call_operand.hbm [shape: f32[1,1], index: 3, kind: output, shape index: {}]  }
   0x1   :  { %9 = vsyncpa [#allocation7], 0 }
   0x2   :  { %10 = vsyncpa [#allocation5], 0  ;;  %s256_s12 = smov [#allocation6]   ;;  %s257_s14 = smov [#allocation3]  }
   0x3   :  { %s36_s13 = sshll.u32 %s256_s12, 4  ;;  %s20_s15 = sshll.u32 %s257_s14, 4  ;;  %s37_s13 = int_to_ptr.vmem [resolvable:$true] %s36_s13  ;;  %s282_s15 = int_to_ptr.vmem [resolvable:$true] %s20_s15 }
   0x4   :  { %s174_s18 = scalar_lea.hbm %s347_s1, 256 }
   0x5   :  { %p175_p0 = scmp.ne.s32.totalorder %s347_s1, %s174_s18  ;;  %p178_p1 = scmp.lt.u32.totalorder %s174_s18, %s347_s1 }
   0x7   :  { %p180_p2 = pnand %p178_p1, %p175_p0 }
   0x9   :  { %183 = shalt.err (!%p180_p2)
}
   0xa   :  { %s184_s23 = scalar_lea.vmem %s37_s13, 256  ;;  %p189_p4 = scmp.lt.s32.totalorder %s37_s13, %s37_s13 }
   0xb   :  { %p185_p3 = scmp.ne.s32.totalorder %s37_s13, %s184_s23  ;;  %p190_p5 = scmp.lt.s32.totalorder %s184_s23, %s184_s23 }
   0xd   :  { %p191_p6 = por %p190_p5, %p189_p4 }
   0xf   :  { %p192_p7 = pnand %p191_p6, %p185_p3 }
  0x11   :  { %195 = shalt.err (!%p192_p7)
}
  0x12   :  { %s258_s24 = smov 128   ;;  %s259_s25 = smov 8  }
  0x13   :  { %42 = dma.hbm_to_vmem [thread:$0]  %s347_s1, 256, %s37_s13, [#allocation7], %s258_s24, %s258_s24, %s259_s25  }
  0x14   :  { %s196_s30 = scalar_lea.hbm %s346_s0, 256 }
  0x15   :  { %p197_p8 = scmp.ne.s32.totalorder %s346_s0, %s196_s30  ;;  %p200_p9 = scmp.lt.u32.totalorder %s196_s30, %s346_s0 }
  0x17   :  { %p202_p10 = pnand %p200_p9, %p197_p8 }
  0x19   :  { %205 = shalt.err (!%p202_p10)
}
  0x1a   :  { %s206_s8 = scalar_lea.vmem %s282_s15, 256  ;;  %p211_p12 = scmp.lt.s32.totalorder %s282_s15, %s282_s15 }
  0x1b   :  { %p207_p11 = scmp.ne.s32.totalorder %s282_s15, %s206_s8  ;;  %p212_p13 = scmp.lt.s32.totalorder %s206_s8, %s206_s8 }
  0x1d   :  { %p213_p0 = por %p212_p13, %p211_p12 }
  0x1f   :  { %p214_p1 = pnand %p213_p0, %p207_p11 }
  0x21   :  { %217 = shalt.err (!%p214_p1)
}
  0x22   :  { %26 = dma.hbm_to_vmem [thread:$0]  %s346_s0, 256, %s282_s15, [#allocation4], %s258_s24, %s258_s24, %s259_s25  }
  0x23   :  { %s260_s10 = smov [#allocation8]   ;;  %s218_s14 = scalar_lea.hbm %s348_s2, 256 }
  0x24   :  { %s52_s11 = sshll.u32 %s260_s10, 4  ;;  %p219_p2 = scmp.ne.s32.totalorder %s348_s2, %s218_s14  ;;  %s53_s11 = int_to_ptr.vmem [resolvable:$true] %s52_s11 }
  0x25   :  { %p222_p3 = scmp.lt.u32.totalorder %s218_s14, %s348_s2 }
  0x27   :  { %p224_p4 = pnand %p222_p3, %p219_p2 }
  0x29   :  { %227 = shalt.err (!%p224_p4)
}
  0x2a   :  { %s228_s20 = scalar_lea.vmem %s53_s11, 256  ;;  %p233_p6 = scmp.lt.s32.totalorder %s53_s11, %s53_s11 }
  0x2b   :  { %p229_p5 = scmp.ne.s32.totalorder %s53_s11, %s228_s20  ;;  %p234_p7 = scmp.lt.s32.totalorder %s228_s20, %s228_s20 }
  0x2d   :  { %p235_p8 = por %p234_p7, %p233_p6 }
  0x2f   :  { %p236_p9 = pnand %p235_p8, %p229_p5 }
  0x31   :  { %239 = shalt.err (!%p236_p9)
}
  0x32   :  { %58 = dma.hbm_to_vmem [thread:$0]  %s348_s2, 256, %s53_s11, [#allocation7], %s258_s24, %s258_s24, %s259_s25  }
  0x33   :  { %250 = dma.done.wait [#allocation4], 256  }
  0x34   :  { %251 = vsyncadd [#allocation4], 4294967040 }
  0x35   :  { %252 = dma.done.wait [#allocation7], 512  }
  0x36   :  { %253 = vsyncadd [#allocation7], 4294966784  ;;  %v79_v0 = vld [vmem:[#allocation3] sm:$0xff]  ;;  %v80_v1 = vld [vmem:[#allocation3 + $0x8] sm:$0xff]  ;;  %s240_s24 = scalar_lea.hbm %s349_s3, 16 }
  0x37   :  { %v87_v2 = vadd.f32 1.0, %v79_v0  ;;  %v96_v3 = vadd.f32 1.0, %v80_v1  ;;  %v90_v4 = vmul.f32 -0.5, %v79_v0  ;;  %v99_v5 = vmul.f32 -0.5, %v80_v1  ;;  %v81_v14 = vld [vmem:[#allocation6] sm:$0xff]  ;;  %v82_v17 = vld [vmem:[#allocation6 + $0x8] sm:$0xff]  ;;  %p241_p10 = scmp.ne.s32.totalorder %s349_s3, %s240_s24  ;;  %p244_p11 = scmp.lt.u32.totalorder %s240_s24, %s349_s3 }
  0x38   :  { %v109_v6 = vsub.f32 2.0, %v79_v0  ;;  %v110_v7 = vsub.f32 2.0, %v80_v1  ;;  %v93_v9 = vand.u32 2147483647, %v79_v0  ;;  %v102_v11 = vand.u32 2147483647, %v80_v1 }
  0x39   :  { %166 = vlog2.f32 %v87_v2  ;;  %v91_v8 = vadd.f32 1.0, %v90_v4  ;;  %v100_v10 = vadd.f32 1.0, %v99_v5  ;;  %v107_v21 = vsub.f32 1.0, %v81_v14  ;;  %v83_v23 = vld [vmem:[#allocation8] sm:$0xff]  ;;  %v84_v27 = vld [vmem:[#allocation8 + $0x8] sm:$0xff]  ;;  %p246_p12 = pnand %p244_p11, %p241_p10 }
  0x3a   :  { %168 = vlog2.f32 %v96_v3  ;;  %vm94_vm0 = vcmp.lt.f32.partialorder %v93_v9, 0.0004427343  ;;  %vm103_vm1 = vcmp.lt.f32.partialorder %v102_v11, 0.0004427343  ;;  %v108_v25 = vsub.f32 1.0, %v82_v17 }
  0x3b   :  { %170 = vlog2.f32 %v109_v6  ;;  %v92_v12 = vmul.f32 %v91_v8, %v79_v0  ;;  %v101_v15 = vmul.f32 %v100_v10, %v80_v1  ;;  %v85_v32 = vsub.f32 0.0, %v83_v23 }
  0x3c   :  { %172 = vlog2.f32 %v110_v7  ;;  %v86_v34 = vsub.f32 0.0, %v84_v27 }
  0x43   :  { %v167_v13 = vpop.eup %166 }
  0x44   :  { %v169_v16 = vpop.eup %168  ;;  %v89_v18 = vmul.f32 0.6931472, %v167_v13 }
  0x45   :  { %v98_v19 = vmul.f32 0.6931472, %v169_v16  ;;  %v171_v22 = vpop.eup %170 }
  0x46   :  { %v95_v20 = vsel %vm94_vm0, %v92_v12, %v89_v18  ;;  %v173_v26 = vpop.eup %172  ;;  %v112_v29 = vmul.f32 0.6931472, %v171_v22 }
  0x47   :  { %v104_v24 = vsel %vm103_vm1, %v101_v15, %v98_v19  ;;  %v105_v28 = vmul.f32 %v95_v20, %v81_v14  ;;  %v114_v31 = vmul.f32 0.6931472, %v173_v26 }
  0x48   :  { %v106_v30 = vmul.f32 %v104_v24, %v82_v17  ;;  %v115_v33 = vmul.f32 %v112_v29, %v107_v21 }
  0x49   :  { %v116_v35 = vmul.f32 %v114_v31, %v108_v25 }
  0x4a   :  { %v117_v36 = vadd.f32 %v115_v33, %v105_v28 }
  0x4b   :  { %v118_v37 = vadd.f32 %v116_v35, %v106_v30 }
  0x4c   :  { %v119_v38 = vmul.f32 %v117_v36, %v85_v32 }
  0x4d   :  { %v120_v39 = vmul.f32 %v118_v37, %v86_v34 }
  0x4f   :  { %v122_v40 = vadd.f32 %v120_v39, %v119_v38 }
  0x51   :  { %129 = vadd.xlane.f32.xlu0 %v122_v40 }
  0xde   :  { %v130_v41 = vpop.xlane.xlu0 %129 }
  0xdf   :  { %v131_v42 = vrot.slane %v130_v41, 4 }
  0xe1   :  { %v132_v43 = vadd.f32 %v131_v42, %v130_v41 }
  0xe3   :  { %v133_v44 = vrot.slane %v132_v43, 2 }
  0xe5   :  { %v134_v45 = vadd.f32 %v133_v44, %v132_v43 }
  0xe7   :  { %v135_v46 = vrot.slane %v134_v45, 1 }
  0xe9   :  { %v136_v47 = vadd.f32 %v135_v46, %v134_v45 }
  0xeb   :  { %158 = vpush %v136_v47 }
 0x11c   :  { %s159_s2 = spop %158 }
 0x11d   :  { %s140_s21 = smul.f32 0.00048828125, %s159_s2 }
 0x11f   :  { %142 = sst [smem:[#allocation9]] %s140_s21 }
 0x120   :  { %249 = shalt.err (!%p246_p12)
}
 0x121   :  { %s261_s29 = smov [#allocation9]  }
 0x122   :  { %150 = dma.smem_to_hbm %s261_s29, 16, %s349_s3, [#allocation5]  }
 0x123   :  { %254 = dma.done.wait [#allocation5], 16  }
 0x124   :  { %255 = vsyncadd [#allocation5], 4294967280 }
 0x125   :  { %154 = sfence }
 0x126   :  { %155 = vsyncpa [#allocation4], 1 }
 0x127   :  { %156 = vsyncpa [#allocation7], 1 }
 0x128   :  { %157 = vsyncpa [#allocation5], 1 }

</bundles_post_ra>
